<compile_context>
chip_gen: v7x
topology: tpu7x:2x2x1
jax: 0.10.0
libtpu: 0.0.40
codegen_flags: <defaults>
</compile_context>

<pallas_src>
import jax
import jax.numpy as jnp
from jax import lax
from jax.experimental import pallas as pl
from jax.experimental.pallas import tpu as pltpu

TAU = 10.0
LANE = 128


def _sig(z):
    # exact identity: 1/(1+exp(-tau*z)) == 0.5*(tanh(tau*z/2)+1)
    return 0.5 * (jnp.tanh((0.5 * TAU) * z) + 1.0)


def _logical_layer_kernel(x_ref, pw0_ref, pb0_ref, pw1_ref, pb1_ref,
                          w0_ref, w1_ref, b_ref,
                          o_ref, max0_ref, max1_ref):
    x = x_ref[...]                                             # (B, Dp)

    # Phi on [x, 1-x] without a lane-axis concat.
    a_x = _sig(pw0_ref[...] * x + pb0_ref[...])                # (B, Dp)
    a_nx = _sig(pw1_ref[...] * (1.0 - x) + pb1_ref[...])       # (B, Dp)

    # max over batch of the post-Phi activations (two halves of max_in).
    max0_ref[...] = jnp.max(a_x, axis=0, keepdims=True)        # (1, Dp)
    max1_ref[...] = jnp.max(a_nx, axis=0, keepdims=True)       # (1, Dp)

    # logits = a_x @ w0^T + a_nx @ w1^T, contracting on the last axis of both
    # operands (w consumed in its stored layout, no in-kernel transpose).
    dn = (((1,), (1,)), ((), ()))
    logits = lax.dot_general(a_x, w0_ref[...], dn,
                             preferred_element_type=jnp.float32)
    logits = logits + lax.dot_general(a_nx, w1_ref[...], dn,
                                      preferred_element_type=jnp.float32)
    o_ref[...] = _sig(logits + b_ref[...])                     # (B, Op)


def _round_up(n, m):
    return ((n + m - 1) // m) * m


def _pad_to(a, shape):
    return jnp.pad(a, [(0, t - s) for s, t in zip(a.shape, shape)])


@jax.jit
def logical_layer_forward(x, phi_w_, phi_b, weight_sigma, weight_exp, prune, b):
    """Returns (o, max_in). All inputs float32.

    x:            (B, D)            raw input (in_features == 2*D)
    phi_w_:       (1, in_features)  raw Phi w_  (w = exp(w_))
    phi_b:        (1, in_features)
    weight_sigma: (out, in)
    weight_exp:   (out, 1)
    prune:        (out, in)
    b:            (1, out)
    """
    B, D = x.shape
    out_f = weight_sigma.shape[0]
    Dp = _round_up(D, LANE)
    Op = _round_up(out_f, LANE)

    # --- per-parameter work, hoisted out of the Pallas kernel ---------------
    w = _sig(weight_sigma) * jnp.exp(weight_exp) * prune       # (out, in)
    w0, w1 = w[:, :D], w[:, D:]                                # (out, D) each
    phi_w = jnp.exp(phi_w_)                                    # (1, in)
    pw0, pw1 = phi_w[:, :D], phi_w[:, D:]
    pb0, pb1 = phi_b[:, :D], phi_b[:, D:]

    # --- pad lane dims to 128 so all kernel loads/stores are lane-dense -----
    # (padded weight rows/cols are zero, so padded activations contribute 0).
    x_p = _pad_to(x, (B, Dp))
    pw0_p, pw1_p = _pad_to(pw0, (1, Dp)), _pad_to(pw1, (1, Dp))
    pb0_p, pb1_p = _pad_to(pb0, (1, Dp)), _pad_to(pb1, (1, Dp))
    w0_p, w1_p = _pad_to(w0, (Op, Dp)), _pad_to(w1, (Op, Dp))
    b_p = _pad_to(b, (1, Op))

    vmem = pl.BlockSpec(memory_space=pltpu.MemorySpace.VMEM)
    o_p, m0, m1 = pl.pallas_call(
        _logical_layer_kernel,
        in_specs=[vmem] * 8,
        out_specs=[vmem] * 3,
        out_shape=[
            jax.ShapeDtypeStruct((B, Op), jnp.float32),
            jax.ShapeDtypeStruct((1, Dp), jnp.float32),
            jax.ShapeDtypeStruct((1, Dp), jnp.float32),
        ],
    )(x_p, pw0_p, pb0_p, pw1_p, pb1_p, w0_p, w1_p, b_p)

    o = o_p[:, :out_f]
    # max_in = max over batch of post-Phi activations, [x-half, (1-x)-half].
    max_in = jnp.concatenate([m0[0, :D], m1[0, :D]], axis=0)   # (in_features,)
    return o, max_in


def _reference(x, phi_w_, phi_b, weight_sigma, weight_exp, prune, b):
    sig = lambda z: 1.0 / (1.0 + jnp.exp(-TAU * z))
    h = jnp.concatenate([x, 1.0 - x], axis=-1)
    a = sig(jnp.exp(phi_w_) * h + phi_b)
    max_in = a.max(axis=0)
    w = sig(weight_sigma) * jnp.exp(weight_exp) * prune
    o = sig(a @ w.T + b)
    return o, max_in


if __name__ == "__main__":
    # Module config: in_features = 16 (so raw x has D = 8 cols), out_features = 8.
    B, D = 8, 8
    in_features = 2 * D
    out_features = 8

    key = jax.random.PRNGKey(0)
    k0, k1, k2, k3, k4, k5 = jax.random.split(key, 6)

    # Deterministic parameter init mirroring reset_parameters():
    phi_w_ = jnp.log(jax.random.uniform(k0, (1, in_features), jnp.float32, 0.1, 0.9) + 1e-8)
    phi_b = jax.random.uniform(k1, (1, in_features), jnp.float32, -0.9, -0.1)
    ws_u = jax.random.uniform(k2, (out_features, in_features), jnp.float32, 0.1, 0.9)
    weight_sigma = jnp.log(ws_u / (1.0 - ws_u))                      # logit
    weight_exp = jnp.log(jax.random.uniform(k3, (out_features, 1), jnp.float32, 0.1, 0.9) + 1e-8)
    b = jax.random.uniform(k4, (1, out_features), jnp.float32, -0.9, -0.1)
    prune = jnp.ones((out_features, in_features), jnp.float32)

    x = jax.random.uniform(k5, (B, D), jnp.float32)

    o, max_in = logical_layer_forward(x, phi_w_, phi_b, weight_sigma,
                                      weight_exp, prune, b)
    jax.block_until_ready((o, max_in))

    o_ref, max_in_ref = _reference(x, phi_w_, phi_b, weight_sigma,
                                   weight_exp, prune, b)
    assert o.shape == o_ref.shape and max_in.shape == max_in_ref.shape
    assert jnp.allclose(o, o_ref, atol=1e-5, rtol=1e-5)
    assert jnp.allclose(max_in, max_in_ref, atol=1e-5, rtol=1e-5)

    print("KERNEL_OK")
</pallas_src>

<mosaic_0001>
module attributes {stable_mosaic.version = 11 : i64} {
  func.func @_logical_layer_kernel(%arg0: memref<8x128xf32, #tpu.memory_space<vmem>>, %arg1: memref<1x128xf32, #tpu.memory_space<vmem>>, %arg2: memref<1x128xf32, #tpu.memory_space<vmem>>, %arg3: memref<1x128xf32, #tpu.memory_space<vmem>>, %arg4: memref<1x128xf32, #tpu.memory_space<vmem>>, %arg5: memref<128x128xf32, #tpu.memory_space<vmem>>, %arg6: memref<128x128xf32, #tpu.memory_space<vmem>>, %arg7: memref<1x128xf32, #tpu.memory_space<vmem>>, %arg8: memref<8x128xf32, #tpu.memory_space<vmem>>, %arg9: memref<1x128xf32, #tpu.memory_space<vmem>>, %arg10: memref<1x128xf32, #tpu.memory_space<vmem>>) attributes {dimension_semantics = [], scalar_prefetch = 0 : i64, scratch_operands = 0 : i64, tpu.core_type = #tpu.core_type<tc>} {
    %c0 = arith.constant 0 : index
    %c0_0 = arith.constant 0 : index
    %0 = vector.load %arg0[%c0, %c0_0] : memref<8x128xf32, #tpu.memory_space<vmem>>, vector<8x128xf32>
    %c0_1 = arith.constant 0 : index
    %c0_2 = arith.constant 0 : index
    %1 = vector.load %arg1[%c0_1, %c0_2] : memref<1x128xf32, #tpu.memory_space<vmem>>, vector<1x128xf32>
    %2 = vector.broadcast %1 : vector<1x128xf32> to vector<8x128xf32>
    %3 = arith.mulf %2, %0 : vector<8x128xf32>
    %c0_3 = arith.constant 0 : index
    %c0_4 = arith.constant 0 : index
    %4 = vector.load %arg2[%c0_3, %c0_4] : memref<1x128xf32, #tpu.memory_space<vmem>>, vector<1x128xf32>
    %5 = vector.broadcast %4 : vector<1x128xf32> to vector<8x128xf32>
    %6 = arith.addf %3, %5 : vector<8x128xf32>
    %cst = arith.constant 5.000000e+00 : f32
    %7 = vector.broadcast %cst : f32 to vector<8x128xf32>
    %8 = arith.mulf %7, %6 : vector<8x128xf32>
    %9 = math.tanh %8 : vector<8x128xf32>
    %cst_5 = arith.constant 1.000000e+00 : f32
    %10 = vector.broadcast %cst_5 : f32 to vector<8x128xf32>
    %11 = arith.addf %9, %10 : vector<8x128xf32>
    %cst_6 = arith.constant 5.000000e-01 : f32
    %12 = vector.broadcast %cst_6 : f32 to vector<8x128xf32>
    %13 = arith.mulf %12, %11 : vector<8x128xf32>
    %c0_7 = arith.constant 0 : index
    %c0_8 = arith.constant 0 : index
    %14 = vector.load %arg3[%c0_7, %c0_8] : memref<1x128xf32, #tpu.memory_space<vmem>>, vector<1x128xf32>
    %cst_9 = arith.constant 1.000000e+00 : f32
    %15 = vector.broadcast %cst_9 : f32 to vector<8x128xf32>
    %16 = arith.subf %15, %0 : vector<8x128xf32>
    %17 = vector.broadcast %14 : vector<1x128xf32> to vector<8x128xf32>
    %18 = arith.mulf %17, %16 : vector<8x128xf32>
    %c0_10 = arith.constant 0 : index
    %c0_11 = arith.constant 0 : index
    %19 = vector.load %arg4[%c0_10, %c0_11] : memref<1x128xf32, #tpu.memory_space<vmem>>, vector<1x128xf32>
    %20 = vector.broadcast %19 : vector<1x128xf32> to vector<8x128xf32>
    %21 = arith.addf %18, %20 : vector<8x128xf32>
    %cst_12 = arith.constant 5.000000e+00 : f32
    %22 = vector.broadcast %cst_12 : f32 to vector<8x128xf32>
    %23 = arith.mulf %22, %21 : vector<8x128xf32>
    %24 = math.tanh %23 : vector<8x128xf32>
    %cst_13 = arith.constant 1.000000e+00 : f32
    %25 = vector.broadcast %cst_13 : f32 to vector<8x128xf32>
    %26 = arith.addf %24, %25 : vector<8x128xf32>
    %cst_14 = arith.constant 5.000000e-01 : f32
    %27 = vector.broadcast %cst_14 : f32 to vector<8x128xf32>
    %28 = arith.mulf %27, %26 : vector<8x128xf32>
    %cst_15 = arith.constant dense<0xFF800000> : vector<128xf32>
    %29 = vector.multi_reduction <maximumf>, %13, %cst_15 [0] : vector<8x128xf32> to vector<128xf32>
    %30 = vector.shape_cast %29 : vector<128xf32> to vector<1x128xf32>
    %c0_16 = arith.constant 0 : index
    %c0_17 = arith.constant 0 : index
    %31 = vector.load %arg9[%c0_16, %c0_17] : memref<1x128xf32, #tpu.memory_space<vmem>>, vector<1x128xf32>
    tpu.vector_store %arg9[%c0_16, %c0_17], %30 {strides = array<i32>} : memref<1x128xf32, #tpu.memory_space<vmem>>, vector<1x128xf32>,
    %cst_18 = arith.constant dense<0xFF800000> : vector<128xf32>
    %32 = vector.multi_reduction <maximumf>, %28, %cst_18 [0] : vector<8x128xf32> to vector<128xf32>
    %33 = vector.shape_cast %32 : vector<128xf32> to vector<1x128xf32>
    %c0_19 = arith.constant 0 : index
    %c0_20 = arith.constant 0 : index
    %34 = vector.load %arg10[%c0_19, %c0_20] : memref<1x128xf32, #tpu.memory_space<vmem>>, vector<1x128xf32>
    tpu.vector_store %arg10[%c0_19, %c0_20], %33 {strides = array<i32>} : memref<1x128xf32, #tpu.memory_space<vmem>>, vector<1x128xf32>,
    %c0_21 = arith.constant 0 : index
    %c0_22 = arith.constant 0 : index
    %35 = vector.load %arg5[%c0_21, %c0_22] : memref<128x128xf32, #tpu.memory_space<vmem>>, vector<128x128xf32>
    %cst_23 = arith.constant dense<0.000000e+00> : vector<8x128xf32>
    %36 = tpu.matmul %13, %35, %cst_23 {dimension_numbers = #tpu.dot_dimension_numbers<[1], [1], [0], [0], [0, 0, 1, 0], [], []>} : vector<8x128xf32>, vector<128x128xf32>, vector<8x128xf32> -> vector<8x128xf32>
    %c0_24 = arith.constant 0 : index
    %c0_25 = arith.constant 0 : index
    %37 = vector.load %arg6[%c0_24, %c0_25] : memref<128x128xf32, #tpu.memory_space<vmem>>, vector<128x128xf32>
    %cst_26 = arith.constant dense<0.000000e+00> : vector<8x128xf32>
    %38 = tpu.matmul %28, %37, %cst_26 {dimension_numbers = #tpu.dot_dimension_numbers<[1], [1], [0], [0], [0, 0, 1, 0], [], []>} : vector<8x128xf32>, vector<128x128xf32>, vector<8x128xf32> -> vector<8x128xf32>
    %39 = arith.addf %36, %38 : vector<8x128xf32>
    %c0_27 = arith.constant 0 : index
    %c0_28 = arith.constant 0 : index
    %40 = vector.load %arg7[%c0_27, %c0_28] : memref<1x128xf32, #tpu.memory_space<vmem>>, vector<1x128xf32>
    %41 = vector.broadcast %40 : vector<1x128xf32> to vector<8x128xf32>
    %42 = arith.addf %39, %41 : vector<8x128xf32>
    %cst_29 = arith.constant 5.000000e+00 : f32
    %43 = vector.broadcast %cst_29 : f32 to vector<8x128xf32>
    %44 = arith.mulf %43, %42 : vector<8x128xf32>
    %45 = math.tanh %44 : vector<8x128xf32>
    %cst_30 = arith.constant 1.000000e+00 : f32
    %46 = vector.broadcast %cst_30 : f32 to vector<8x128xf32>
    %47 = arith.addf %45, %46 : vector<8x128xf32>
    %cst_31 = arith.constant 5.000000e-01 : f32
    %48 = vector.broadcast %cst_31 : f32 to vector<8x128xf32>
    %49 = arith.mulf %48, %47 : vector<8x128xf32>
    %c0_32 = arith.constant 0 : index
    %c0_33 = arith.constant 0 : index
    %50 = vector.load %arg8[%c0_32, %c0_33] : memref<8x128xf32, #tpu.memory_space<vmem>>, vector<8x128xf32>
    tpu.vector_store %arg8[%c0_32, %c0_33], %49 {strides = array<i32>} : memref<8x128xf32, #tpu.memory_space<vmem>>, vector<8x128xf32>,
    return
  }
}

</mosaic_0001>

<bundles_post_ra>
// kernel: logical_layer_forward.1
= control target key start
LH: loop header
LB: loop body
LE: loop exit
PB: predicated region body
PF: predicated region fallthrough
CT: control target
= control target key end

     0   :  { %v487_v3 = vmov 0.0|0.0   ;;  %vm488_vm0 = vmmov 0   ;;  %v489_v7 = vmov 0.0   ;;  %s694_s0 = inlined_call_operand.vmem [shape: f32[8,128], index: 0, kind: input, shape index: {}]   ;;  %s695_s1 = inlined_call_operand.vmem [shape: f32[1,128], index: 1, kind: input, shape index: {}]   ;;  %s696_s2 = inlined_call_operand.vmem [shape: f32[1,128], index: 2, kind: input, shape index: {}]   ;;  %s697_s3 = inlined_call_operand.vmem [shape: f32[1,128], index: 3, kind: input, shape index: {}]   ;;  %s698_s4 = inlined_call_operand.vmem [shape: f32[1,128], index: 4, kind: input, shape index: {}]   ;;  %s699_s5 = inlined_call_operand.vmem [shape: f32[128,128], index: 5, kind: input, shape index: {}]   ;;  %s700_s6 = inlined_call_operand.vmem [shape: f32[128,128], index: 6, kind: input, shape index: {}]   ;;  %s701_s7 = inlined_call_operand.vmem [shape: f32[1,128], index: 7, kind: input, shape index: {}]   ;;  %s702_s8 = inlined_call_operand.hbm [shape: f32[8,128], index: 8, kind: output, shape index: {0}]   ;;  %s703_s9 = inlined_call_operand.vmem [shape: f32[1,128], index: 9, kind: output, shape index: {1}]   ;;  %s704_s10 = inlined_call_operand.vmem [shape: f32[1,128], index: 10, kind: output, shape index: {2}]  }
   0x1   :  { %v105_v0 = vld [vmem:[%s700_s6] sm:$0xff]  ;;  %v106_v1 = vld [vmem:[%s700_s6 + $0x8] sm:$0xff]  ;;  %405 = vmatprep.subr.bf16.mxu0 %v487_v3  ;;  %429 = vmatprep.subr.bf16.mxu1 %v487_v3  ;;  %v107_v8 = vld [vmem:[%s700_s6 + $0x10] sm:$0xff] }
   0x2   :  { %v89_v2 = vld [vmem:[%s699_s5] sm:$0xff]  ;;  %v406_v4 = vpack.c.bf16 %v106_v1, %v105_v0  ;;  %v90_v5 = vld [vmem:[%s699_s5 + $0x8] sm:$0xff]  ;;  %367 = vmatprep.mubr.msk.f32.mxu0 %vm488_vm0, %v489_v7  ;;  %402 = vmatprep.mubr.msk.f32.mxu1 %vm488_vm0, %v489_v7  ;;  %v108_v9 = vld [vmem:[%s700_s6 + $0x18] sm:$0xff] }
   0x3   :  { %v430_v6 = vpack.c.bf16 %v90_v5, %v89_v2  ;;  %v91_v10 = vld [vmem:[%s699_s5 + $0x10] sm:$0xff]  ;;  %v92_v11 = vld [vmem:[%s699_s5 + $0x18] sm:$0xff]  ;;  %v409_v12 = vpack.c.bf16 %v108_v9, %v107_v8  ;;  %v109_v14 = vld [vmem:[%s700_s6 + $0x20] sm:$0xff] }
   0x4   :  { %407 = vmatpush3.bf16.xpose.msra.mxu0 %v406_v4  ;;  %v433_v13 = vpack.c.bf16 %v92_v11, %v91_v10  ;;  %v33_v15 = vld [vmem:[%s694_s0] sm:$0xff]  ;;  %v110_v16 = vld [vmem:[%s700_s6 + $0x28] sm:$0xff] }
   0x5   :  { %431 = vmatpush3.bf16.xpose.msra.mxu1 %v430_v6  ;;  %408 = vmatprep.subr.bf16.mxu0 %v487_v3  ;;  %v298_v17 = vld [vmem:[%s697_s3] ss:$0 sm:$0xff]  ;;  %v55_v18 = vsub.f32 1.0, %v33_v15 }
   0x6   :  { %432 = vmatprep.subr.bf16.mxu1 %v487_v3  ;;  %v299_v19 = vld [vmem:[%s698_s4] ss:$0 sm:$0xff] }
   0x7   :  { %v296_v20 = vld [vmem:[%s695_s1] ss:$0 sm:$0xff] }
   0x8   :  { %v297_v21 = vld [vmem:[%s696_s2] ss:$0 sm:$0xff] }
   0xc   :  { %410 = vmatpush3.bf16.xpose.msra.mxu0 %v409_v12 }
   0xd   :  { %434 = vmatpush3.bf16.xpose.msra.mxu1 %v433_v13  ;;  %411 = vmatprep.subr.bf16.mxu0 %v487_v3 }
   0xe   :  { %16 = vsyncpa [#allocation3], 0  ;;  %435 = vmatprep.subr.bf16.mxu1 %v487_v3  ;;  %v93_v22 = vld [vmem:[%s699_s5 + $0x20] sm:$0xff]  ;;  %v94_v23 = vld [vmem:[%s699_s5 + $0x28] sm:$0xff]  ;;  %v62_v24 = vmul.f32 %v298_v17, %v55_v18  ;;  %v41_v25 = vmul.f32 %v296_v20, %v33_v15  ;;  %v412_v26 = vpack.c.bf16 %v110_v16, %v109_v14 }
   0xf   :  { %v436_v29 = vpack.c.bf16 %v94_v23, %v93_v22  ;;  %v111_v32 = vld [vmem:[%s700_s6 + $0x30] sm:$0xff]  ;;  %v112_v33 = vld [vmem:[%s700_s6 + $0x38] sm:$0xff]  ;;  %v113_v38 = vld [vmem:[%s700_s6 + $0x40] sm:$0xff] }
  0x10   :  { %v70_v27 = vadd.f32 %v299_v19, %v62_v24  ;;  %v49_v28 = vadd.f32 %v297_v21, %v41_v25  ;;  %v95_v34 = vld [vmem:[%s699_s5 + $0x30] sm:$0xff]  ;;  %v96_v35 = vld [vmem:[%s699_s5 + $0x38] sm:$0xff]  ;;  %v415_v36 = vpack.c.bf16 %v112_v33, %v111_v32  ;;  %v114_v39 = vld [vmem:[%s700_s6 + $0x48] sm:$0xff] }
  0x11   :  { %v439_v37 = vpack.c.bf16 %v96_v35, %v95_v34  ;;  %v97_v41 = vld [vmem:[%s699_s5 + $0x40] sm:$0xff]  ;;  %v98_v42 = vld [vmem:[%s699_s5 + $0x48] sm:$0xff]  ;;  %v418_v45 = vpack.c.bf16 %v114_v39, %v113_v38  ;;  %v115_v52 = vld [vmem:[%s700_s6 + $0x50] sm:$0xff] }
  0x12   :  { %v71_v30 = vmul.f32 5.0, %v70_v27  ;;  %v50_v31 = vmul.f32 5.0, %v49_v28  ;;  %v442_v47 = vpack.c.bf16 %v98_v42, %v97_v41  ;;  %v116_v53 = vld [vmem:[%s700_s6 + $0x58] sm:$0xff]  ;;  %v99_v55 = vld [vmem:[%s699_s5 + $0x50] sm:$0xff]  ;;  %v117_v2 = vld [vmem:[%s700_s6 + $0x60] sm:$0xff] }
  0x13   :  { %v100_v56 = vld [vmem:[%s699_s5 + $0x58] sm:$0xff]  ;;  %v421_v59 = vpack.c.bf16 %v116_v53, %v115_v52  ;;  %v118_v4 = vld [vmem:[%s700_s6 + $0x68] sm:$0xff]  ;;  %v101_v6 = vld [vmem:[%s699_s5 + $0x60] sm:$0xff] }
  0x14   :  { %413 = vmatpush3.bf16.xpose.msra.mxu0 %v412_v26  ;;  %457 = vtanh.f32 %v71_v30  ;;  %v445_v61 = vpack.c.bf16 %v100_v56, %v99_v55  ;;  %v102_v7 = vld [vmem:[%s699_s5 + $0x68] sm:$0xff]  ;;  %v424_v9 = vpack.c.bf16 %v118_v4, %v117_v2  ;;  %v119_v11 = vld [vmem:[%s700_s6 + $0x70] sm:$0xff]  ;;  %v120_v12 = vld [vmem:[%s700_s6 + $0x78] sm:$0xff] }
  0x15   :  { %437 = vmatpush3.bf16.xpose.msra.mxu1 %v436_v29  ;;  %414 = vmatprep.subr.bf16.mxu0 %v487_v3  ;;  %459 = vtanh.f32 %v50_v31  ;;  %v448_v10 = vpack.c.bf16 %v102_v7, %v101_v6  ;;  %v103_v13 = vld [vmem:[%s699_s5 + $0x70] sm:$0xff]  ;;  %v104_v14 = vld [vmem:[%s699_s5 + $0x78] sm:$0xff]  ;;  %v427_v15 = vpack.c.bf16 %v120_v12, %v119_v11  ;;  %s490_s5 = smov [#allocation2]  }
  0x16   :  { %438 = vmatprep.subr.bf16.mxu1 %v487_v3  ;;  %v451_v16 = vpack.c.bf16 %v104_v14, %v103_v13  ;;  %s280_s20 = sshll.u32 %s490_s5, 4  ;;  %s281_s20 = int_to_ptr.vmem [resolvable:$true] %s280_s20 }
  0x17   :  { %s463_s0 = scalar_lea.vmem %s281_s20, 128  ;;  %p468_p1 = scmp.lt.s32.totalorder %s281_s20, %s281_s20 }
  0x18   :  { %p464_p0 = scmp.ne.s32.totalorder %s281_s20, %s463_s0  ;;  %p469_p2 = scmp.lt.s32.totalorder %s463_s0, %s463_s0 }
  0x1a   :  { %p470_p3 = por %p469_p2, %p468_p1 }
  0x1c   :  { %416 = vmatpush3.bf16.xpose.msra.mxu0 %v415_v36  ;;  %p471_p4 = pnand %p470_p3, %p464_p0 }
  0x1d   :  { %440 = vmatpush3.bf16.xpose.msra.mxu1 %v439_v37  ;;  %417 = vmatprep.subr.bf16.mxu0 %v487_v3 }
  0x1e   :  { %v458_v40 = vpop.eup %457  ;;  %441 = vmatprep.subr.bf16.mxu1 %v487_v3 }
  0x1f   :  { %v460_v43 = vpop.eup %459  ;;  %v73_v44 = vadd.f32 1.0, %v458_v40 }
  0x20   :  { %v52_v46 = vadd.f32 1.0, %v460_v43 }
  0x21   :  { %v74_v48 = vmul.f32 0.5, %v73_v44 }
  0x22   :  { %v53_v49 = vmul.f32 0.5, %v52_v46 }
  0x23   :  { %v82_v50 = vrot.slane %v74_v48, 4 }
  0x24   :  { %419 = vmatpush3.bf16.xpose.msra.mxu0 %v418_v45  ;;  %v75_v51 = vrot.slane %v53_v49, 4 }
  0x25   :  { %443 = vmatpush3.bf16.xpose.msra.mxu1 %v442_v47  ;;  %420 = vmatprep.subr.bf16.mxu0 %v487_v3  ;;  %v83_v54 = vmax.f32 %v74_v48, %v82_v50 }
  0x26   :  { %444 = vmatprep.subr.bf16.mxu1 %v487_v3  ;;  %v76_v57 = vmax.f32 %v53_v49, %v75_v51 }
  0x27   :  { %v84_v58 = vrot.slane %v83_v54, 2 }
  0x28   :  { %v77_v60 = vrot.slane %v76_v57, 2 }
  0x29   :  { %v85_v62 = vmax.f32 %v83_v54, %v84_v58 }
  0x2a   :  { %v78_v63 = vmax.f32 %v76_v57, %v77_v60 }
  0x2b   :  { %v86_v0 = vrot.slane %v85_v62, 1 }
  0x2c   :  { %422 = vmatpush3.bf16.xpose.msra.mxu0 %v421_v59  ;;  %v79_v1 = vrot.slane %v78_v63, 1 }
  0x2d   :  { %446 = vmatpush3.bf16.xpose.msra.mxu1 %v445_v61  ;;  %423 = vmatprep.subr.bf16.mxu0 %v487_v3  ;;  %v87_v5 = vmax.f32 %v85_v62, %v86_v0 }
  0x2e   :  { %447 = vmatprep.subr.bf16.mxu1 %v487_v3  ;;  %v80_v8 = vmax.f32 %v78_v63, %v79_v1 }
  0x2f   :  { %88 = vst [vmem:[%s704_s10] sm:$0x1] %v87_v5 }
  0x30   :  { %81 = vst [vmem:[%s703_s9] sm:$0x1] %v80_v8 }
  0x34   :  { %425 = vmatpush3.bf16.xpose.msra.mxu0 %v424_v9 }
  0x35   :  { %449 = vmatpush3.bf16.xpose.msra.mxu1 %v448_v10  ;;  %426 = vmatprep.subr.bf16.mxu0 %v487_v3 }
  0x36   :  { %450 = vmatprep.subr.bf16.mxu1 %v487_v3  ;;  %v300_v3 = vld [vmem:[%s701_s7] ss:$0 sm:$0xff] }
  0x3c   :  { %428 = vmatpush3.bf16.xpose.msra.mxu0 %v427_v15 }
  0x3d   :  { %452 = vmatpush3.bf16.xpose.msra.mxu1 %v451_v16 }
  0x43   :  { %368 = vmatmul.mubr.f32.vlgmr.msra.gmra.mrb[0].mxu0 %v74_v48 }
  0x44   :  { %403 = vmatmul.mubr.f32.vlgmr.msra.gmra.mrb[0].mxu1 %v53_v49 }
 0x116   :  { %v187_v17 = vpop.f32.mrb[0].mxu0 }
 0x117   :  { %v257_v18 = vpop.f32.mrb[0].mxu1  ;;  %v369_v19 = vpop.f32.mrb[1].mxu0 }
 0x118   :  { %v258_v20 = vadd.f32 %v257_v18, %v187_v17  ;;  %v404_v21 = vpop.f32.mrb[1].mxu1 }
 0x11a   :  { %v268_v22 = vadd.f32 %v300_v3, %v258_v20 }
 0x11c   :  { %v269_v23 = vmul.f32 5.0, %v268_v22 }
 0x11e   :  { %461 = vtanh.f32 %v269_v23 }
 0x128   :  { %v462_v24 = vpop.eup %461 }
 0x129   :  { %v271_v25 = vadd.f32 1.0, %v462_v24 }
 0x12b   :  { %v272_v26 = vmul.f32 0.5, %v271_v25 }
 0x12d   :  { %273 = vst [vmem:[#allocation2] sm:$0xff] %v272_v26 }
 0x12e   :  { %474 = shalt.err (!%p471_p4)
}
 0x12f   :  { %s475_s3 = scalar_lea.hbm %s702_s8, 128 }
 0x130   :  { %p476_p5 = scmp.ne.s32.totalorder %s702_s8, %s475_s3  ;;  %p479_p6 = scmp.lt.u32.totalorder %s475_s3, %s702_s8 }
 0x132   :  { %p481_p7 = pnand %p479_p6, %p476_p5 }
 0x134   :  { %484 = shalt.err (!%p481_p7)
}
 0x135   :  { %283 = dma.vmem_to_hbm [thread:$0]  %s281_s20, 128, %s702_s8, [#allocation3]  }
 0x136   :  { %485 = dma.done.wait [#allocation3], 128  }
 0x137   :  { %486 = vsyncadd [#allocation3], 4294967168 }
 0x138   :  { %295 = vsyncpa [#allocation3], 1 }

</bundles_post_ra>
